<compile_context>
chip_gen: v7x
topology: tpu7x:2x2x1
jax: 0.10.0
libtpu: 0.0.40
codegen_flags: <defaults>
</compile_context>

<pallas_src>
import functools

import jax
import jax.numpy as jnp
from jax import lax
from jax.experimental import pallas as pl
from jax.experimental.pallas import tpu as pltpu


def _infonce_kernel(zi_ref, zj_ref, z_ref, loss_i_ref, loss_j_ref, *,
                    N, TM, inv_temp, matmul_dtype, precision):
    start = pl.multiple_of(pl.program_id(0) * TM, TM)

    # Row tiles (f32) for this grid step.
    zi_t = zi_ref[...].astype(jnp.float32)          # (TM, D)
    zj_t = zj_ref[...].astype(jnp.float32)          # (TM, D)

    # Positive-pair logit, identical for global row g of z_i and of z_j:
    #   pos[t] = <z_i[g], z_j[g]> / T   (row-wise, no diagonal extraction)
    pos = jnp.sum(zi_t * zj_t, axis=1, keepdims=True) * inv_temp   # (TM, 1)

    # Fold 1/T into the small row-tile operand; cast matmul operands
    # (bf16 keeps the v6e/v7x MXU fast; accumulation stays f32).
    zi_s = (zi_t * inv_temp).astype(matmul_dtype)   # (TM, D)
    zj_s = (zj_t * inv_temp).astype(matmul_dtype)   # (TM, D)
    z_c = z_ref[...].astype(matmul_dtype)           # (2N, D), resident

    # Similarities on the MXU: contract over D on both operands (no transpose).
    dn = (((1,), (1,)), ((), ()))
    mm = functools.partial(lax.dot_general, dimension_numbers=dn,
                           preferred_element_type=jnp.float32,
                           precision=precision)
    sim_i = mm(zi_s, z_c)                           # (TM, 2N)
    sim_j = mm(zj_s, z_c)                           # (TM, 2N)

    # Mask the self-similarity (diagonal of the full 2Nx2N matrix) BEFORE the
    # max -> numerically safe shift even for unnormalized inputs.
    row = lax.broadcasted_iota(jnp.int32, (TM, 2 * N), 0)
    col = lax.broadcasted_iota(jnp.int32, (TM, 2 * N), 1)
    neg_big = jnp.float32(-1e30)
    sim_i = jnp.where(col == row + start, neg_big, sim_i)
    sim_j = jnp.where(col == row + start + N, neg_big, sim_j)

    # Stable logsumexp over the exact reference logit set:
    #   logits_row = [pos] ++ all off-diagonal similarities
    # (pos also appears inside sim_* -> it is counted twice, as in the module).
    m_i = jnp.max(sim_i, axis=1, keepdims=True)     # (TM, 1)
    m_j = jnp.max(sim_j, axis=1, keepdims=True)     # (TM, 1)

    den_i = (jnp.sum(jnp.exp(sim_i - m_i), axis=1, keepdims=True)
             + jnp.exp(pos - m_i))
    den_j = (jnp.sum(jnp.exp(sim_j - m_j), axis=1, keepdims=True)
             + jnp.exp(pos - m_j))

    # Per-row cross-entropy with label 0:  logsumexp(logits) - pos
    loss_i_ref[...] = jnp.log(den_i) + m_i - pos
    loss_j_ref[...] = jnp.log(den_j) + m_j - pos


def _pick_block_rows(N):
    # Largest power-of-two row tile that divides N and keeps the (TM, 2N)
    # similarity working set comfortably inside VMEM; else the full N.
    budget = 28 * 1024 * 1024
    for cand in (512, 256, 128, 64, 32, 16, 8):
        if N % cand == 0 and 8 * cand * (2 * N) * 4 <= budget:
            return cand
    return N


def infonce_loss(z_i, z_j, temperature, *, matmul_dtype=jnp.float32,
                 block_rows=None):
    N, D = z_i.shape
    assert z_j.shape == (N, D)

    TM = _pick_block_rows(N) if block_rows is None else block_rows
    assert N % TM == 0
    n_tiles = N // TM

    # Accurate f32 matmul when operands are f32; default precision for bf16.
    if jnp.dtype(matmul_dtype) == jnp.dtype(jnp.float32):
        precision = lax.Precision.HIGHEST
    else:
        precision = None

    kernel = functools.partial(
        _infonce_kernel, N=N, TM=TM,
        inv_temp=float(1.0 / float(temperature)),
        matmul_dtype=matmul_dtype, precision=precision)

    z_i32 = z_i.astype(jnp.float32)
    z_j32 = z_j.astype(jnp.float32)
    z = jnp.concatenate([z_i32, z_j32], axis=0)     # (2N, D), resident operand

    # Rough VMEM budget: resident z (+ cast), double-buffered row tiles,
    # two (TM, 2N) sim tiles plus exp temporaries; capped at 64 MiB (v7x).
    est = (3 * 2 * N * D * 4          # resident z (2 bufs) + bf16 cast
           + 4 * TM * D * 4           # zi/zj row tiles, double buffered
           + 10 * TM * 2 * N * 4      # sim_i/sim_j + temporaries
           + (2 << 20))
    vmem_limit = int(min(64 * 1024 * 1024, max(16 * 1024 * 1024, est)))

    out_shape = (jax.ShapeDtypeStruct((N, 1), jnp.float32),
                 jax.ShapeDtypeStruct((N, 1), jnp.float32))

    loss_i, loss_j = pl.pallas_call(
        kernel,
        out_shape=out_shape,
        grid_spec=pltpu.PrefetchScalarGridSpec(
            num_scalar_prefetch=0,
            grid=(n_tiles,),
            in_specs=[
                pl.BlockSpec((TM, D), lambda r: (r, 0)),      # z_i row tile
                pl.BlockSpec((TM, D), lambda r: (r, 0)),      # z_j row tile
                pl.BlockSpec((2 * N, D), lambda r: (0, 0)),   # z resident
            ],
            out_specs=[
                pl.BlockSpec((TM, 1), lambda r: (r, 0)),      # per-row loss (i)
                pl.BlockSpec((TM, 1), lambda r: (r, 0)),      # per-row loss (j)
            ],
        ),
        compiler_params=pltpu.CompilerParams(
            dimension_semantics=("parallel",),
            vmem_limit_bytes=vmem_limit,
        ),
    )(z_i32, z_j32, z)

    return (jnp.sum(loss_i) + jnp.sum(loss_j)) / jnp.float32(2 * N)


# JIT wrapper (temperature / dtype / tile size are compile-time constants).
infonce_loss_jit = jax.jit(
    infonce_loss, static_argnames=("temperature", "matmul_dtype", "block_rows"))


def _infonce_ref(z_i, z_j, temperature):
    # Pure-JAX reference mirroring the PyTorch forward exactly.
    N = z_i.shape[0]
    z = jnp.concatenate([z_i, z_j], axis=0)
    sim = jnp.matmul(z, z.T, precision=lax.Precision.HIGHEST) / temperature
    pos = jnp.concatenate([jnp.diagonal(sim, offset=N),
                           jnp.diagonal(sim, offset=-N)], axis=0)[:, None]
    twoN = 2 * N
    neg_mask = ~jnp.eye(twoN, dtype=bool)
    neg = sim[neg_mask].reshape(twoN, twoN - 1)
    logits = jnp.concatenate([pos, neg], axis=1)
    lse = jax.scipy.special.logsumexp(logits, axis=1)
    return jnp.mean(lse - logits[:, 0])


if __name__ == "__main__":
    key = jax.random.PRNGKey(0)
    k1, k2 = jax.random.split(key)
    N, D = 8, 32
    temperature = 0.5

    z_i = jax.random.normal(k1, (N, D), dtype=jnp.float32)
    z_j = jax.random.normal(k2, (N, D), dtype=jnp.float32)

    ref = _infonce_ref(z_i, z_j, temperature)

    # f32 matmul path: matches the f32 reference tightly.
    loss = jax.block_until_ready(infonce_loss_jit(z_i, z_j, temperature))
    assert jnp.isfinite(loss), loss
    assert jnp.allclose(loss, ref, rtol=1e-4, atol=1e-4), (loss, ref)

    # bf16-operand matmul path (fast MXU path on v6e/v7x), f32 accumulation.
    loss_bf16 = jax.block_until_ready(
        infonce_loss_jit(z_i, z_j, temperature, matmul_dtype=jnp.bfloat16))
    assert jnp.isfinite(loss_bf16), loss_bf16
    assert jnp.allclose(loss_bf16, ref, rtol=5e-2, atol=5e-2), (loss_bf16, ref)

    print("KERNEL_OK")
</pallas_src>

<mosaic_0001>
module attributes {stable_mosaic.version = 11 : i64} {
  func.func @_infonce_kernel(%arg0: i32, %arg1: memref<8x32xf32, #tpu.memory_space<vmem>>, %arg2: memref<8x32xf32, #tpu.memory_space<vmem>>, %arg3: memref<16x32xf32, #tpu.memory_space<vmem>>, %arg4: memref<8x1xf32, #tpu.memory_space<vmem>>, %arg5: memref<8x1xf32, #tpu.memory_space<vmem>>) attributes {dimension_semantics = [#tpu.dimension_semantics<parallel>], iteration_bounds = array<i64: 1>, scalar_prefetch = 0 : i64, scratch_operands = 0 : i64, tpu.core_type = #tpu.core_type<tc>, window_params = [{transform_indices = @transform_0, window_bounds = array<i64: 8, 32>}, {transform_indices = @transform_1, window_bounds = array<i64: 8, 32>}, {pipeline_mode = #tpu.pipeline_mode<synchronous>, transform_indices = @transform_2, window_bounds = array<i64: 16, 32>}, {transform_indices = @transform_3, window_bounds = array<i64: 8, 1>}, {transform_indices = @transform_4, window_bounds = array<i64: 8, 1>}]} {
    %c8_i32 = arith.constant 8 : i32
    %0 = arith.muli %arg0, %c8_i32 : i32
    %1 = tpu.assume_multiple %0, 8 : i32
    %c0 = arith.constant 0 : index
    %c0_0 = arith.constant 0 : index
    %2 = vector.load %arg1[%c0, %c0_0] : memref<8x32xf32, #tpu.memory_space<vmem>>, vector<8x32xf32>
    %c0_1 = arith.constant 0 : index
    %c0_2 = arith.constant 0 : index
    %3 = vector.load %arg2[%c0_1, %c0_2] : memref<8x32xf32, #tpu.memory_space<vmem>>, vector<8x32xf32>
    %4 = arith.mulf %2, %3 : vector<8x32xf32>
    %cst = arith.constant dense<0.000000e+00> : vector<8xf32>
    %5 = vector.multi_reduction <add>, %4, %cst [1] : vector<8x32xf32> to vector<8xf32>
    %6 = vector.shape_cast %5 : vector<8xf32> to vector<8x1xf32>
    %cst_3 = arith.constant 2.000000e+00 : f32
    %7 = vector.broadcast %cst_3 : f32 to vector<8x1xf32>
    %8 = arith.mulf %6, %7 : vector<8x1xf32>
    %cst_4 = arith.constant 2.000000e+00 : f32
    %9 = vector.broadcast %cst_4 : f32 to vector<8x32xf32>
    %10 = arith.mulf %2, %9 : vector<8x32xf32>
    %cst_5 = arith.constant 2.000000e+00 : f32
    %11 = vector.broadcast %cst_5 : f32 to vector<8x32xf32>
    %12 = arith.mulf %3, %11 : vector<8x32xf32>
    %c0_6 = arith.constant 0 : index
    %c0_7 = arith.constant 0 : index
    %13 = vector.load %arg3[%c0_6, %c0_7] : memref<16x32xf32, #tpu.memory_space<vmem>>, vector<16x32xf32>
    %cst_8 = arith.constant dense<0.000000e+00> : vector<8x16xf32>
    %14 = tpu.matmul %10, %13, %cst_8 {dimension_numbers = #tpu.dot_dimension_numbers<[1], [1], [0], [0], [0, 0, 1, 0], [], []>, precision = #tpu.contract_precision<fp32>} : vector<8x32xf32>, vector<16x32xf32>, vector<8x16xf32> -> vector<8x16xf32>
    %cst_9 = arith.constant dense<0.000000e+00> : vector<8x16xf32>
    %15 = tpu.matmul %12, %13, %cst_9 {dimension_numbers = #tpu.dot_dimension_numbers<[1], [1], [0], [0], [0, 0, 1, 0], [], []>, precision = #tpu.contract_precision<fp32>} : vector<8x32xf32>, vector<16x32xf32>, vector<8x16xf32> -> vector<8x16xf32>
    %16 = tpu.iota {dimensions = array<i32: 0>} : vector<8x16xi32>
    %17 = tpu.iota {dimensions = array<i32: 1>} : vector<8x16xi32>
    %18 = vector.broadcast %1 : i32 to vector<8x16xi32>
    %19 = arith.addi %16, %18 : vector<8x16xi32>
    %20 = arith.cmpi eq, %17, %19 : vector<8x16xi32>
    %cst_10 = arith.constant -1.000000e+30 : f32
    %21 = vector.broadcast %cst_10 : f32 to vector<8x16xf32>
    %22 = arith.select %20, %21, %14 : vector<8x16xi1>, vector<8x16xf32>
    %23 = vector.broadcast %1 : i32 to vector<8x16xi32>
    %24 = arith.addi %16, %23 : vector<8x16xi32>
    %c8_i32_11 = arith.constant 8 : i32
    %25 = vector.broadcast %c8_i32_11 : i32 to vector<8x16xi32>
    %26 = arith.addi %24, %25 : vector<8x16xi32>
    %27 = arith.cmpi eq, %17, %26 : vector<8x16xi32>
    %cst_12 = arith.constant -1.000000e+30 : f32
    %28 = vector.broadcast %cst_12 : f32 to vector<8x16xf32>
    %29 = arith.select %27, %28, %15 : vector<8x16xi1>, vector<8x16xf32>
    %cst_13 = arith.constant dense<0xFF800000> : vector<8xf32>
    %30 = vector.multi_reduction <maximumf>, %22, %cst_13 [1] : vector<8x16xf32> to vector<8xf32>
    %31 = vector.shape_cast %30 : vector<8xf32> to vector<8x1xf32>
    %cst_14 = arith.constant dense<0xFF800000> : vector<8xf32>
    %32 = vector.multi_reduction <maximumf>, %29, %cst_14 [1] : vector<8x16xf32> to vector<8xf32>
    %33 = vector.shape_cast %32 : vector<8xf32> to vector<8x1xf32>
    %34 = vector.broadcast %31 : vector<8x1xf32> to vector<8x16xf32>
    %35 = arith.subf %22, %34 : vector<8x16xf32>
    %36 = math.exp %35 : vector<8x16xf32>
    %cst_15 = arith.constant dense<0.000000e+00> : vector<8xf32>
    %37 = vector.multi_reduction <add>, %36, %cst_15 [1] : vector<8x16xf32> to vector<8xf32>
    %38 = vector.shape_cast %37 : vector<8xf32> to vector<8x1xf32>
    %39 = arith.subf %8, %31 : vector<8x1xf32>
    %40 = math.exp %39 : vector<8x1xf32>
    %41 = arith.addf %38, %40 : vector<8x1xf32>
    %42 = vector.broadcast %33 : vector<8x1xf32> to vector<8x16xf32>
    %43 = arith.subf %29, %42 : vector<8x16xf32>
    %44 = math.exp %43 : vector<8x16xf32>
    %cst_16 = arith.constant dense<0.000000e+00> : vector<8xf32>
    %45 = vector.multi_reduction <add>, %44, %cst_16 [1] : vector<8x16xf32> to vector<8xf32>
    %46 = vector.shape_cast %45 : vector<8xf32> to vector<8x1xf32>
    %47 = arith.subf %8, %33 : vector<8x1xf32>
    %48 = math.exp %47 : vector<8x1xf32>
    %49 = arith.addf %46, %48 : vector<8x1xf32>
    %50 = math.log %41 : vector<8x1xf32>
    %51 = arith.addf %50, %31 : vector<8x1xf32>
    %52 = arith.subf %51, %8 : vector<8x1xf32>
    %c0_17 = arith.constant 0 : index
    %c0_18 = arith.constant 0 : index
    %53 = vector.load %arg4[%c0_17, %c0_18] : memref<8x1xf32, #tpu.memory_space<vmem>>, vector<8x1xf32>
    tpu.vector_store %arg4[%c0_17, %c0_18], %52 {strides = array<i32>} : memref<8x1xf32, #tpu.memory_space<vmem>>, vector<8x1xf32>,
    %54 = math.log %49 : vector<8x1xf32>
    %55 = arith.addf %54, %33 : vector<8x1xf32>
    %56 = arith.subf %55, %8 : vector<8x1xf32>
    %c0_19 = arith.constant 0 : index
    %c0_20 = arith.constant 0 : index
    %57 = vector.load %arg5[%c0_19, %c0_20] : memref<8x1xf32, #tpu.memory_space<vmem>>, vector<8x1xf32>
    tpu.vector_store %arg5[%c0_19, %c0_20], %56 {strides = array<i32>} : memref<8x1xf32, #tpu.memory_space<vmem>>, vector<8x1xf32>,
    return
  }
  func.func @transform_0(%arg0: i32) -> (i32, i32) {
    %c0_i32 = arith.constant 0 : i32
    %c0_i32_0 = arith.constant 0 : i32
    return %arg0, %c0_i32 : i32, i32
  }
  func.func @transform_1(%arg0: i32) -> (i32, i32) {
    %c0_i32 = arith.constant 0 : i32
    %c0_i32_0 = arith.constant 0 : i32
    return %arg0, %c0_i32 : i32, i32
  }
  func.func @transform_2(%arg0: i32) -> (i32, i32) {
    %c0_i32 = arith.constant 0 : i32
    %c0_i32_0 = arith.constant 0 : i32
    %c0_i32_1 = arith.constant 0 : i32
    return %c0_i32, %c0_i32_0 : i32, i32
  }
  func.func @transform_3(%arg0: i32) -> (i32, i32) {
    %c0_i32 = arith.constant 0 : i32
    %c0_i32_0 = arith.constant 0 : i32
    return %arg0, %c0_i32 : i32, i32
  }
  func.func @transform_4(%arg0: i32) -> (i32, i32) {
    %c0_i32 = arith.constant 0 : i32
    %c0_i32_0 = arith.constant 0 : i32
    return %arg0, %c0_i32 : i32, i32
  }
}

</mosaic_0001>

<bundles_post_ra>
// kernel: infonce_loss.1
= control target key start
LH: loop header
LB: loop body
LE: loop exit
PB: predicated region body
PF: predicated region fallthrough
CT: control target
= control target key end

     0   :  { %vm20_vm0 = vcmask 261120   ;;  %v1207_v0 = vmov 0.0|0.0   ;;  %vm1208_vm1 = vmmov 0   ;;  %v1209_v6 = vmov 0.0   ;;  %s1312_s2 = inlined_call_operand.vmem [shape: f32[16,32], index: 2, kind: input, shape index: {}]   ;;  %s1313_s0 = inlined_call_operand.vmem [shape: f32[8,32], index: 0, kind: input, shape index: {}]   ;;  %s1314_s1 = inlined_call_operand.vmem [shape: f32[8,32], index: 1, kind: input, shape index: {}]   ;;  %s1315_s3 = inlined_call_operand.vmem [shape: f32[8,1], index: 3, kind: output, shape index: {0}]   ;;  %s1316_s4 = inlined_call_operand.vmem [shape: f32[8,1], index: 4, kind: output, shape index: {1}]  }
   0x1   :  { %1136 = vmatprep.subr.bf16.mxu0 %v1207_v0  ;;  %v27_v1 = vld [vmem:[%s1312_s2] sm:$0xff]  ;;  %v28_v2 = vld [vmem:[%s1312_s2 + $0x8] sm:$0xff]  ;;  %1154 = vmatprep.subr.bf16.mxu1 %v1207_v0  ;;  %v959_v38 = vlaneseq  ;;  %vm970_vm3 = vcmask 130048   ;;  %vm1001_vm5 = vcmask 7168  }
   0x2   :  { %v1246_v3 = vld [vmem:[%s1313_s0] sm:$0xff]  ;;  %v33_v4 = vsel %vm20_vm0, %v27_v1, 0  ;;  %v36_v5 = vsel %vm20_vm0, %v28_v2, 0  ;;  %1056 = vmatprep.mubr.msk.f32.mxu0 %vm1208_vm1, %v1209_v6  ;;  %1098 = vmatprep.mubr.msk.f32.mxu1 %vm1208_vm1, %v1209_v6 }
   0x3   :  { %v25_v7 = vmul.f32 2.0, %v1246_v3  ;;  %v1258_v8 = vld [vmem:[%s1314_s1] sm:$0xff]  ;;  %v39_v9 = vand.u32 4294901760, %v33_v4  ;;  %v42_v10 = vand.u32 4294901760, %v36_v5  ;;  %v960_v39 = vshrl.u32 %v959_v38, 7 }
   0x4   :  { %v26_v11 = vmul.f32 2.0, %v1258_v8  ;;  %v19_v36 = vmul.f32 %v1258_v8, %v1246_v3  ;;  %v962_v40 = vand.u32 127, %v959_v38 }
   0x5   :  { %v30_v12 = vsel %vm20_vm0, %v25_v7, 0  ;;  %v1137_v13 = vpack.c.bf16 %v42_v10, %v39_v9  ;;  %v117_v15 = vsub.f32 %v33_v4, %v39_v9  ;;  %v124_v16 = vsub.f32 %v36_v5, %v42_v10 }
   0x6   :  { %v1262_v14 = vand.u32 4294901760, %v30_v12  ;;  %v498_v17 = vsel %vm20_vm0, %v26_v11, 0  ;;  %v21_v37 = vsel %vm20_vm0, %v19_v36, 0.0  ;;  %v967_v41 = vadd.s32 8, %v960_v39 }
   0x7   :  { %1138 = vmatpush3.bf16.xpose.msra.mxu0 %v1137_v13  ;;  %1156 = vmatpush3.bf16.xpose.msra.mxu1 %v1137_v13  ;;  %v118_v19 = vand.u32 4294901760, %v117_v15  ;;  %v125_v20 = vand.u32 4294901760, %v124_v16  ;;  %v567_v21 = vand.u32 4294901760, %v498_v17  ;;  %v1143_v34 = vpack.c.bf16 %v124_v16, %v117_v15 }
   0x8   :  { %v106_v18 = vsub.f32 %v30_v12, %v1262_v14  ;;  %1139 = vmatprep.subr.bf16.mxu0 %v1207_v0  ;;  %1157 = vmatprep.subr.bf16.mxu1 %v1207_v0  ;;  %vm965_vm2 = vcmp.eq.s32.totalorder %v962_v40, %v960_v39  ;;  %vm968_vm4 = vcmp.eq.s32.totalorder %v962_v40, %v967_v41 }
   0x9   :  { %v119_v23 = vsub.f32 %v117_v15, %v118_v19  ;;  %v126_v24 = vsub.f32 %v124_v16, %v125_v20  ;;  %v568_v25 = vsub.f32 %v498_v17, %v567_v21  ;;  %v1149_v35 = vpack.c.bf16 %v125_v20, %v118_v19  ;;  %22 = vadd.xlane.f32.xlu1 %v21_v37 }
   0xa   :  { %v107_v22 = vand.u32 4294901760, %v106_v18 }
   0xb   :  { %v120_v27 = vand.u32 4294901760, %v119_v23  ;;  %v127_v28 = vand.u32 4294901760, %v126_v24  ;;  %v569_v29 = vand.u32 4294901760, %v568_v25 }
   0xc   :  { %v108_v26 = vsub.f32 %v106_v18, %v107_v22 }
   0xd   :  { %v1140_v31 = vpack.c.bf16 %v127_v28, %v120_v27  ;;  %v570_v32 = vsub.f32 %v568_v25, %v569_v29 }
   0xe   :  { %v109_v30 = vand.u32 4294901760, %v108_v26 }
   0xf   :  { %v571_v33 = vand.u32 4294901760, %v570_v32 }
  0x10   :  { %1057 = vmatmul.mubr.f32.vlgmr.msra.gmra.mrb[0].mxu0 %v109_v30 }
  0x11   :  { %1141 = vmatpush3.bf16.xpose.msra.mxu0 %v1140_v31  ;;  %1063 = vmatprep.mubr.msk.f32.mxu0 %vm1208_vm1, %v1209_v6 }
  0x12   :  { %1099 = vmatmul.mubr.f32.vlgmr.msra.gmra.mrb[0].mxu1 %v571_v33  ;;  %1142 = vmatprep.subr.bf16.mxu0 %v1207_v0 }
  0x13   :  { %1159 = vmatpush3.bf16.xpose.msra.mxu1 %v1140_v31  ;;  %1105 = vmatprep.mubr.msk.f32.mxu1 %vm1208_vm1, %v1209_v6 }
  0x14   :  { %1160 = vmatprep.subr.bf16.mxu1 %v1207_v0 }
  0x18   :  { %1064 = vmatmul.mubr.f32.vlgmr.msra.gmra.mrb[0].mxu0 %v1262_v14 }
  0x19   :  { %1144 = vmatpush3.bf16.xpose.msra.mxu0 %v1143_v34  ;;  %1070 = vmatprep.mubr.msk.f32.mxu0 %vm1208_vm1, %v1209_v6 }
  0x1a   :  { %1106 = vmatmul.mubr.f32.vlgmr.msra.gmra.mrb[0].mxu1 %v567_v21  ;;  %1145 = vmatprep.subr.bf16.mxu0 %v1207_v0 }
  0x1b   :  { %1162 = vmatpush3.bf16.xpose.msra.mxu1 %v1143_v34  ;;  %1112 = vmatprep.mubr.msk.f32.mxu1 %vm1208_vm1, %v1209_v6 }
  0x1c   :  { %1163 = vmatprep.subr.bf16.mxu1 %v1207_v0 }
  0x20   :  { %1071 = vmatmul.mubr.f32.vlgmr.msra.gmra.mrb[0].mxu0 %v106_v18 }
  0x21   :  { %1147 = vmatpush3.bf16.xpose.msra.mxu0 %v1137_v13  ;;  %1077 = vmatprep.mubr.msk.f32.mxu0 %vm1208_vm1, %v1209_v6 }
  0x22   :  { %1113 = vmatmul.mubr.f32.vlgmr.msra.gmra.mrb[0].mxu1 %v568_v25  ;;  %1148 = vmatprep.subr.bf16.mxu0 %v1207_v0 }
  0x23   :  { %1165 = vmatpush3.bf16.xpose.msra.mxu1 %v1137_v13  ;;  %1119 = vmatprep.mubr.msk.f32.mxu1 %vm1208_vm1, %v1209_v6 }
  0x24   :  { %1166 = vmatprep.subr.bf16.mxu1 %v1207_v0 }
  0x28   :  { %1078 = vmatmul.mubr.f32.vlgmr.msra.gmra.mrb[0].mxu0 %v107_v22 }
  0x29   :  { %1150 = vmatpush3.bf16.xpose.msra.mxu0 %v1149_v35  ;;  %1084 = vmatprep.mubr.msk.f32.mxu0 %vm1208_vm1, %v1209_v6 }
  0x2a   :  { %1120 = vmatmul.mubr.f32.vlgmr.msra.gmra.mrb[0].mxu1 %v569_v29  ;;  %1151 = vmatprep.subr.bf16.mxu0 %v1207_v0 }
  0x2b   :  { %1168 = vmatpush3.bf16.xpose.msra.mxu1 %v1149_v35  ;;  %1126 = vmatprep.mubr.msk.f32.mxu1 %vm1208_vm1, %v1209_v6 }
  0x2c   :  { %1169 = vmatprep.subr.bf16.mxu1 %v1207_v0 }
  0x30   :  { %1085 = vmatmul.mubr.f32.vlgmr.msra.gmra.mrb[0].mxu0 %v1262_v14 }
  0x31   :  { %1153 = vmatpush3.bf16.xpose.msra.mxu0 %v1137_v13  ;;  %1091 = vmatprep.mubr.msk.f32.mxu0 %vm1208_vm1, %v1209_v6 }
  0x32   :  { %1127 = vmatmul.mubr.f32.vlgmr.msra.gmra.mrb[0].mxu1 %v567_v21 }
  0x33   :  { %1171 = vmatpush3.bf16.xpose.msra.mxu1 %v1137_v13  ;;  %1133 = vmatprep.mubr.msk.f32.mxu1 %vm1208_vm1, %v1209_v6 }
  0x38   :  { %1092 = vmatmul.mubr.f32.vlgmr.msra.gmra.mrb[0].mxu0 %v1262_v14 }
  0x3a   :  { %1134 = vmatmul.mubr.f32.vlgmr.msra.gmra.mrb[0].mxu1 %v567_v21 }
  0x96   :  { %v23_v60 = vpop.xlane.xlu1 %22 }
  0x97   :  { %v24_v61 = vmul.f32 2.0, %v23_v60 }
 0x10b   :  { %v493_v42 = vpop.f32.mrb[0].mxu0 }
 0x10c   :  { %v966_v43 = vsel %vm965_vm2, -1e+30, %v493_v42  ;;  %v1093_v44 = vpop.f32.mrb[1].mxu0 }
 0x10d   :  { %v955_v45 = vpop.f32.mrb[0].mxu1  ;;  %v971_v46 = vsel %vm970_vm3, %v966_v43, -inf }
 0x10e   :  { %v969_v47 = vsel %vm968_vm4, -1e+30, %v955_v45  ;;  %v1135_v48 = vpop.f32.mrb[1].mxu1  ;;  %972 = vmax.xlane.f32.xlu0 %v971_v46 }
 0x10f   :  { %v974_v49 = vsel %vm970_vm3, %v969_v47, -inf }
 0x112   :  { %975 = vmax.xlane.f32.xlu0 %v974_v49 }
 0x19b   :  { %v973_v50 = vpop.xlane.xlu0 %972 }
 0x19c   :  { %v977_v51 = vsub.f32 %v966_v43, %v973_v50  ;;  %v983_v62 = vsub.f32 %v24_v61, %v973_v50 }
 0x19e   :  { %v978_v52 = vmul.f32 1.442695, %v977_v51  ;;  %v984_v63 = vmul.f32 1.442695, %v983_v62 }
 0x19f   :  { %v976_v53 = vpop.xlane.xlu0 %975 }
 0x1a0   :  { %1195 = vpow2.f32 %v978_v52  ;;  %v987_v54 = vsub.f32 %v969_v47, %v976_v53  ;;  %v993_v0 = vsub.f32 %v24_v61, %v976_v53 }
 0x1a2   :  { %v988_v55 = vmul.f32 1.442695, %v987_v54  ;;  %v994_v1 = vmul.f32 1.442695, %v993_v0 }
 0x1a4   :  { %1197 = vpow2.f32 %v988_v55 }
 0x1a5   :  { %1199 = vpow2.f32 %v984_v63 }
 0x1a6   :  { %1201 = vpow2.f32 %v994_v1 }
 0x1aa   :  { %v1196_v56 = vpop.eup %1195 }
 0x1ab   :  { %v980_v57 = vsel %vm970_vm3, %v1196_v56, 0.0 }
 0x1ac   :  { %981 = vadd.xlane.f32.xlu1 %v980_v57 }
 0x1ae   :  { %v1198_v58 = vpop.eup %1197 }
 0x1af   :  { %v990_v59 = vsel %vm970_vm3, %v1198_v58, 0.0  ;;  %v1200_v2 = vpop.eup %1199 }
 0x1b0   :  { %991 = vadd.xlane.f32.xlu0 %v990_v59  ;;  %v1202_v5 = vpop.eup %1201 }
 0x239   :  { %v982_v3 = vpop.xlane.xlu1 %981 }
 0x23a   :  { %v986_v4 = vadd.f32 %v1200_v2, %v982_v3 }
 0x23c   :  { %1203 = vlog2.f32 %v986_v4 }
 0x23d   :  { %v992_v6 = vpop.xlane.xlu0 %991 }
 0x23e   :  { %v996_v7 = vadd.f32 %v1202_v5, %v992_v6 }
 0x240   :  { %1205 = vlog2.f32 %v996_v7 }
 0x246   :  { %v1204_v8 = vpop.eup %1203 }
 0x247   :  { %v998_v9 = vmul.f32 0.6931472, %v1204_v8 }
 0x249   :  { %v999_v10 = vadd.f32 %v998_v9, %v973_v50 }
 0x24a   :  { %v1206_v11 = vpop.eup %1205 }
 0x24b   :  { %v1000_v12 = vsub.f32 %v999_v10, %v24_v61  ;;  %v1004_v13 = vmul.f32 0.6931472, %v1206_v11 }
 0x24d   :  { %1002 = vst.msk [vmem:[%s1315_s3] sm:$0xff] %vm1001_vm5, %v1000_v12  ;;  %v1005_v14 = vadd.f32 %v1004_v13, %v976_v53 }
 0x24f   :  { %v1006_v15 = vsub.f32 %v1005_v14, %v24_v61 }
 0x251   :  { %1007 = vst.msk [vmem:[%s1316_s4] sm:$0xff] %vm1001_vm5, %v1006_v15 }

</bundles_post_ra>
